<compile_context>
chip_gen: v7x
topology: tpu7x:2x2x1
jax: 0.10.0
libtpu: 0.0.40
codegen_flags: <defaults>
</compile_context>

<pallas_src>
import functools

import numpy as np
import jax
import jax.numpy as jnp
from jax.experimental import pallas as pl
from jax.experimental.pallas import tpu as pltpu

# ----- irreps bookkeeping (hard-coded for "8x0e + 8x1o") -----
MUL_SCALAR = 8          # 8x0e in irreps_out
MUL_GATED = 8           # 8x1o in irreps_out
L_GATED_DIM = 3         # 2l+1 for l=1
DIM_IN = MUL_SCALAR + MUL_GATED * L_GATED_DIM               # 32
DIM_MID = MUL_SCALAR + MUL_GATED + MUL_GATED * L_GATED_DIM  # 40 (gate.irreps_in)
DIM_OUT = MUL_SCALAR + MUL_GATED * L_GATED_DIM              # 32

FOLD = 4                       # rows folded into the lane axis
LANES_IN = FOLD * DIM_IN       # 128
LANES_MID = FOLD * DIM_MID     # 160
LANES_OUT = FOLD * DIM_OUT     # 128

LEAKY_SLOPE = 0.01             # torch.nn.LeakyReLU default


def _round_up(a, b):
    return ((a + b - 1) // b) * b


def _gated_kernel(x_ref, w_ref, p_ref, g_ref, slope_ref, smask_ref, o_ref):
    """One lane-dense tile of folded rows: equivariant linear + Gate."""
    x = x_ref[...]                                             # (T, 128)  x.dtype
    # Wrapped layer f: one MXU matmul against the replicated block-diagonal
    # equivariant weight (f32 accumulation even for bf16 I/O).
    y = jnp.dot(x, w_ref[...], preferred_element_type=jnp.float32)   # (T, 160) f32

    # LeakyReLU on the 0e-scalar mid-lanes only: slope_ref holds LEAKY_SLOPE at
    # scalar lanes and 1.0 everywhere else, so non-scalar lanes pass through.
    ly = y * jnp.where(y < 0.0, slope_ref[...], 1.0)           # (T, 160) f32

    # Gate expansion on the idle MXU: route each gate pre-activation to the 3
    # output lanes of its 1o irrep (g_ref is a 0/1 matrix), then sigmoid on the
    # lane-dense (T, 128) tile.  Output scalar lanes get u = 0 and are fixed up
    # with smask below.
    u = jnp.dot(y, g_ref[...], preferred_element_type=jnp.float32)   # (T, 128)
    sig = jax.nn.sigmoid(u)

    # Project mid lanes to output lanes (drop the gate lanes) -- 0/1 matrix on
    # the MXU, so no cross-lane relayouts on the VPU.
    vals = jnp.dot(ly, p_ref[...], preferred_element_type=jnp.float32)  # (T, 128)

    smask = smask_ref[...]                        # (1, 128): 1.0 at scalar lanes
    mult = smask + (1.0 - smask) * sig            # 1 for scalars, sigmoid(gate) for 1o
    o_ref[...] = (vals * mult).astype(o_ref.dtype)


@functools.partial(jax.jit, static_argnames=("tile_rows",))
def gated_forward(x, params, *, tile_rows=2048):
    """x: (N, 32), params from build_gate_params -> (N, 32), same dtype as x.

    tile_rows counts *folded* rows (each covers FOLD=4 original rows).
    """
    w_big, p_mat, g_mat, slope_lanes, scalar_mask = params
    n, dim_in = x.shape
    assert dim_in == DIM_IN

    # Fold 4 rows into the lane axis and pad so the grid divides evenly.
    folded = -(-n // FOLD)
    tile = _round_up(max(8, min(tile_rows, _round_up(folded, 8))), 8)
    folded_pad = _round_up(folded, tile)
    n_pad = folded_pad * FOLD
    if n_pad != n:
        x = jnp.pad(x, ((0, n_pad - n), (0, 0)))
    xf = x.reshape(folded_pad, LANES_IN)          # free row-major view

    grid = (folded_pad // tile,)
    out_f = pl.pallas_call(
        _gated_kernel,
        out_shape=jax.ShapeDtypeStruct((folded_pad, LANES_OUT), x.dtype),
        grid_spec=pltpu.PrefetchScalarGridSpec(
            num_scalar_prefetch=0,
            grid=grid,
            in_specs=[
                pl.BlockSpec((tile, LANES_IN), lambda i: (i, 0)),
                pl.BlockSpec((LANES_IN, LANES_MID), lambda i: (0, 0)),
                pl.BlockSpec((LANES_MID, LANES_OUT), lambda i: (0, 0)),
                pl.BlockSpec((LANES_MID, LANES_OUT), lambda i: (0, 0)),
                pl.BlockSpec((1, LANES_MID), lambda i: (0, 0)),
                pl.BlockSpec((1, LANES_OUT), lambda i: (0, 0)),
            ],
            out_specs=pl.BlockSpec((tile, LANES_OUT), lambda i: (i, 0)),
        ),
        compiler_params=pltpu.CompilerParams(
            dimension_semantics=("parallel",)),
    )(xf, w_big, p_mat, g_mat, slope_lanes, scalar_mask)

    return out_f.reshape(n_pad, DIM_OUT)[:n]


def build_equivariant_weight(key):
    """Block-diagonal equivariant linear weight (DIM_IN, DIM_MID) for `f`."""
    k0, k1 = jax.random.split(key)
    w0 = jax.random.normal(k0, (MUL_SCALAR, MUL_SCALAR + MUL_GATED),
                           dtype=jnp.float32) / jnp.sqrt(float(MUL_SCALAR))
    w1 = jax.random.normal(k1, (MUL_GATED, MUL_GATED),
                           dtype=jnp.float32) / jnp.sqrt(float(MUL_GATED))
    w1_kron = jnp.kron(w1, jnp.eye(L_GATED_DIM, dtype=jnp.float32))  # (24, 24)

    w_full = jnp.zeros((DIM_IN, DIM_MID), dtype=jnp.float32)
    w_full = w_full.at[:MUL_SCALAR, :MUL_SCALAR + MUL_GATED].set(w0)
    w_full = w_full.at[MUL_SCALAR:, MUL_SCALAR + MUL_GATED:].set(w1_kron)
    return w_full


def build_gate_params(w_full, dtype=jnp.float32):
    """Build lane-dense kernel operands from the (32, 40) equivariant weight.

    Returns (w_big, P, G, slope_lanes, scalar_mask):
      w_big       (128,160) block-diag of 4 copies of w_full (in `dtype`)
      P           (160,128) 0/1 matrix: mid lanes -> output lanes (drops gates)
      G           (160,128) 0/1 matrix: gate mid lane -> its 3 output 1o lanes
      slope_lanes (1,160)   LEAKY_SLOPE at scalar mid lanes, 1.0 elsewhere
      scalar_mask (1,128)   1.0 at output scalar lanes, 0.0 at gated lanes
    """
    w_np = np.asarray(w_full, dtype=np.float32)
    w_big = np.zeros((LANES_IN, LANES_MID), np.float32)
    p_mat = np.zeros((LANES_MID, LANES_OUT), np.float32)
    g_mat = np.zeros((LANES_MID, LANES_OUT), np.float32)
    slope = np.ones((1, LANES_MID), np.float32)
    smask = np.zeros((1, LANES_OUT), np.float32)

    for g in range(FOLD):
        io, mo, oo = g * DIM_IN, g * DIM_MID, g * DIM_OUT
        w_big[io:io + DIM_IN, mo:mo + DIM_MID] = w_np
        for s in range(MUL_SCALAR):
            p_mat[mo + s, oo + s] = 1.0
            slope[0, mo + s] = LEAKY_SLOPE
            smask[0, oo + s] = 1.0
        for j in range(MUL_GATED):
            for c in range(L_GATED_DIM):
                mid_gated = mo + MUL_SCALAR + MUL_GATED + j * L_GATED_DIM + c
                out_gated = oo + MUL_SCALAR + j * L_GATED_DIM + c
                p_mat[mid_gated, out_gated] = 1.0
                g_mat[mo + MUL_SCALAR + j, out_gated] = 1.0

    return (jnp.asarray(w_big, dtype),
            jnp.asarray(p_mat, jnp.float32),
            jnp.asarray(g_mat, jnp.float32),
            jnp.asarray(slope, jnp.float32),
            jnp.asarray(smask, jnp.float32))


def gated_reference(x, w_full):
    """Pure-JAX reference of the same forward pass (sanity check)."""
    y = x @ w_full
    scalars = y[:, :MUL_SCALAR]
    gates = y[:, MUL_SCALAR:MUL_SCALAR + MUL_GATED]
    gated = y[:, MUL_SCALAR + MUL_GATED:]
    scalars_act = jnp.where(scalars >= 0, scalars, LEAKY_SLOPE * scalars)
    g = jax.nn.sigmoid(gates)
    gated3 = gated.reshape(-1, MUL_GATED, L_GATED_DIM) * g[:, :, None]
    return jnp.concatenate(
        [scalars_act, gated3.reshape(-1, MUL_GATED * L_GATED_DIM)], axis=-1)


if __name__ == "__main__":
    key = jax.random.PRNGKey(0)
    kx, kw = jax.random.split(key)

    N = 1000  # deliberately not a multiple of fold/tile to exercise padding
    x = jax.random.normal(kx, (N, DIM_IN), dtype=jnp.float32)
    w_full = build_equivariant_weight(kw)

    # --- f32 path, small tile so the grid has >1 step (feeds both v7x TCs) ---
    params_f32 = build_gate_params(w_full, dtype=jnp.float32)
    out = jax.block_until_ready(gated_forward(x, params_f32, tile_rows=128))
    ref = gated_reference(x, w_full)
    assert out.shape == (N, DIM_OUT)
    assert jnp.allclose(out, ref, rtol=1e-4, atol=1e-4)

    # --- bf16 I/O path (default big tile, clamped to the data size) ---
    x_bf16 = x.astype(jnp.bfloat16)
    params_bf16 = build_gate_params(w_full, dtype=jnp.bfloat16)
    out_bf = jax.block_until_ready(gated_forward(x_bf16, params_bf16))
    ref_bf = gated_reference(x_bf16.astype(jnp.float32),
                             w_full.astype(jnp.bfloat16).astype(jnp.float32))
    assert out_bf.shape == (N, DIM_OUT)
    assert jnp.allclose(out_bf.astype(jnp.float32), ref_bf, rtol=2e-2, atol=2e-2)

    print("KERNEL_OK")
</pallas_src>

<mosaic_0001>
module attributes {stable_mosaic.version = 11 : i64} {
  func.func @_gated_kernel(%arg0: i32, %arg1: memref<128x128xf32, #tpu.memory_space<vmem>>, %arg2: memref<128x160xf32, #tpu.memory_space<vmem>>, %arg3: memref<160x128xf32, #tpu.memory_space<vmem>>, %arg4: memref<160x128xf32, #tpu.memory_space<vmem>>, %arg5: memref<1x160xf32, #tpu.memory_space<vmem>>, %arg6: memref<1x128xf32, #tpu.memory_space<vmem>>, %arg7: memref<128x128xf32, #tpu.memory_space<vmem>>) attributes {dimension_semantics = [#tpu.dimension_semantics<parallel>], iteration_bounds = array<i64: 2>, scalar_prefetch = 0 : i64, scratch_operands = 0 : i64, tpu.core_type = #tpu.core_type<tc>, window_params = [{transform_indices = @transform_0, window_bounds = array<i64: 128, 128>}, {pipeline_mode = #tpu.pipeline_mode<synchronous>, transform_indices = @transform_1, window_bounds = array<i64: 128, 160>}, {pipeline_mode = #tpu.pipeline_mode<synchronous>, transform_indices = @transform_2, window_bounds = array<i64: 160, 128>}, {pipeline_mode = #tpu.pipeline_mode<synchronous>, transform_indices = @transform_3, window_bounds = array<i64: 160, 128>}, {pipeline_mode = #tpu.pipeline_mode<synchronous>, transform_indices = @transform_4, window_bounds = array<i64: 1, 160>}, {pipeline_mode = #tpu.pipeline_mode<synchronous>, transform_indices = @transform_5, window_bounds = array<i64: 1, 128>}, {transform_indices = @transform_6, window_bounds = array<i64: 128, 128>}]} {
    %c0 = arith.constant 0 : index
    %c0_0 = arith.constant 0 : index
    %0 = vector.load %arg1[%c0, %c0_0] : memref<128x128xf32, #tpu.memory_space<vmem>>, vector<128x128xf32>
    %c0_1 = arith.constant 0 : index
    %c0_2 = arith.constant 0 : index
    %1 = vector.load %arg2[%c0_1, %c0_2] : memref<128x160xf32, #tpu.memory_space<vmem>>, vector<128x160xf32>
    %cst = arith.constant dense<0.000000e+00> : vector<128x160xf32>
    %2 = tpu.matmul %0, %1, %cst {dimension_numbers = #tpu.dot_dimension_numbers<[1], [0], [0], [1], [0, 0, 1, 1], [], []>} : vector<128x128xf32>, vector<128x160xf32>, vector<128x160xf32> -> vector<128x160xf32>
    %cst_3 = arith.constant 0.000000e+00 : f32
    %3 = vector.broadcast %cst_3 : f32 to vector<128x160xf32>
    %4 = arith.cmpf olt, %2, %3 : vector<128x160xf32>
    %c0_4 = arith.constant 0 : index
    %c0_5 = arith.constant 0 : index
    %5 = vector.load %arg5[%c0_4, %c0_5] : memref<1x160xf32, #tpu.memory_space<vmem>>, vector<1x160xf32>
    %cst_6 = arith.constant 1.000000e+00 : f32
    %6 = vector.shape_cast %5 : vector<1x160xf32> to vector<1x160xf32>
    %7 = vector.broadcast %6 : vector<1x160xf32> to vector<128x160xf32>
    %8 = vector.broadcast %cst_6 : f32 to vector<128x160xf32>
    %9 = arith.select %4, %7, %8 : vector<128x160xi1>, vector<128x160xf32>
    %10 = arith.mulf %2, %9 : vector<128x160xf32>
    %c0_7 = arith.constant 0 : index
    %c0_8 = arith.constant 0 : index
    %11 = vector.load %arg4[%c0_7, %c0_8] : memref<160x128xf32, #tpu.memory_space<vmem>>, vector<160x128xf32>
    %cst_9 = arith.constant dense<0.000000e+00> : vector<128x128xf32>
    %12 = tpu.matmul %2, %11, %cst_9 {dimension_numbers = #tpu.dot_dimension_numbers<[1], [0], [0], [1], [0, 0, 1, 1], [], []>} : vector<128x160xf32>, vector<160x128xf32>, vector<128x128xf32> -> vector<128x128xf32>
    %13 = arith.negf %12 : vector<128x128xf32>
    %14 = math.exp %13 : vector<128x128xf32>
    %cst_10 = arith.constant 1.000000e+00 : f32
    %15 = vector.broadcast %cst_10 : f32 to vector<128x128xf32>
    %16 = arith.addf %15, %14 : vector<128x128xf32>
    %17 = arith.divf %15, %16 : vector<128x128xf32>
    %c0_11 = arith.constant 0 : index
    %c0_12 = arith.constant 0 : index
    %18 = vector.load %arg3[%c0_11, %c0_12] : memref<160x128xf32, #tpu.memory_space<vmem>>, vector<160x128xf32>
    %cst_13 = arith.constant dense<0.000000e+00> : vector<128x128xf32>
    %19 = tpu.matmul %10, %18, %cst_13 {dimension_numbers = #tpu.dot_dimension_numbers<[1], [0], [0], [1], [0, 0, 1, 1], [], []>} : vector<128x160xf32>, vector<160x128xf32>, vector<128x128xf32> -> vector<128x128xf32>
    %c0_14 = arith.constant 0 : index
    %c0_15 = arith.constant 0 : index
    %20 = vector.load %arg6[%c0_14, %c0_15] : memref<1x128xf32, #tpu.memory_space<vmem>>, vector<1x128xf32>
    %cst_16 = arith.constant 1.000000e+00 : f32
    %21 = vector.broadcast %cst_16 : f32 to vector<1x128xf32>
    %22 = arith.subf %21, %20 : vector<1x128xf32>
    %23 = vector.broadcast %22 : vector<1x128xf32> to vector<128x128xf32>
    %24 = arith.mulf %23, %17 : vector<128x128xf32>
    %25 = vector.broadcast %20 : vector<1x128xf32> to vector<128x128xf32>
    %26 = arith.addf %25, %24 : vector<128x128xf32>
    %27 = arith.mulf %19, %26 : vector<128x128xf32>
    %c0_17 = arith.constant 0 : index
    %c0_18 = arith.constant 0 : index
    %28 = vector.load %arg7[%c0_17, %c0_18] : memref<128x128xf32, #tpu.memory_space<vmem>>, vector<128x128xf32>
    tpu.vector_store %arg7[%c0_17, %c0_18], %27 {strides = array<i32>} : memref<128x128xf32, #tpu.memory_space<vmem>>, vector<128x128xf32>,
    return
  }
  func.func @transform_0(%arg0: i32) -> (i32, i32) {
    %c0_i32 = arith.constant 0 : i32
    %c0_i32_0 = arith.constant 0 : i32
    return %arg0, %c0_i32 : i32, i32
  }
  func.func @transform_1(%arg0: i32) -> (i32, i32) {
    %c0_i32 = arith.constant 0 : i32
    %c0_i32_0 = arith.constant 0 : i32
    %c0_i32_1 = arith.constant 0 : i32
    return %c0_i32, %c0_i32_0 : i32, i32
  }
  func.func @transform_2(%arg0: i32) -> (i32, i32) {
    %c0_i32 = arith.constant 0 : i32
    %c0_i32_0 = arith.constant 0 : i32
    %c0_i32_1 = arith.constant 0 : i32
    return %c0_i32, %c0_i32_0 : i32, i32
  }
  func.func @transform_3(%arg0: i32) -> (i32, i32) {
    %c0_i32 = arith.constant 0 : i32
    %c0_i32_0 = arith.constant 0 : i32
    %c0_i32_1 = arith.constant 0 : i32
    return %c0_i32, %c0_i32_0 : i32, i32
  }
  func.func @transform_4(%arg0: i32) -> (i32, i32) {
    %c0_i32 = arith.constant 0 : i32
    %c0_i32_0 = arith.constant 0 : i32
    %c0_i32_1 = arith.constant 0 : i32
    return %c0_i32, %c0_i32_0 : i32, i32
  }
  func.func @transform_5(%arg0: i32) -> (i32, i32) {
    %c0_i32 = arith.constant 0 : i32
    %c0_i32_0 = arith.constant 0 : i32
    %c0_i32_1 = arith.constant 0 : i32
    return %c0_i32, %c0_i32_0 : i32, i32
  }
  func.func @transform_6(%arg0: i32) -> (i32, i32) {
    %c0_i32 = arith.constant 0 : i32
    %c0_i32_0 = arith.constant 0 : i32
    return %arg0, %c0_i32 : i32, i32
  }
}

</mosaic_0001>

<bundles_post_ra>
// kernel: gated_forward.1
= control target key start
LH: loop header
LB: loop body
LE: loop exit
PB: predicated region body
PF: predicated region fallthrough
CT: control target
= control target key end

     0   :  { %s1519_s21 = smov 0   ;;  %s2039_s0 = inlined_call_operand.vmem [shape: f32[256,128], index: 0, kind: input, shape index: {}]   ;;  %s2040_s1 = inlined_call_operand.vmem [shape: f32[128,160], index: 1, kind: input, shape index: {}]   ;;  %s2041_s2 = inlined_call_operand.vmem [shape: f32[160,128], index: 2, kind: input, shape index: {}]   ;;  %s2042_s3 = inlined_call_operand.vmem [shape: f32[160,128], index: 3, kind: input, shape index: {}]   ;;  %s2043_s4 = inlined_call_operand.vmem [shape: f32[1,160], index: 4, kind: input, shape index: {}]   ;;  %s2044_s5 = inlined_call_operand.vmem [shape: f32[1,128], index: 5, kind: input, shape index: {}]   ;;  %s2045_s6 = inlined_call_operand.vmem [shape: f32[256,128], index: 6, kind: output, shape index: {}]  }
   0x1 LB: > { %s1229_s22 = sadd.s32 4294967295, %s1480_s21   ;;  %p1233_p0 = scmp.ge.s32.totalorder %s1480_s21, 1  ;;  %s1480_s21 = sphi %s1519_s21, %s16_s21  }
   0x2   : > { %p213_p1 = scmp.lt.s32.totalorder %s1480_s21, 3 }
   0x4   : > { %p214_p2 = pnand %p1233_p0, %p213_p1 }
   0x5   : > { %v272_v0 = vld [vmem:[%s2040_s1 + $0x8] sm:$0xff] (!%p214_p2)  ;;  %v274_v1 = vld [vmem:[%s2040_s1 + $0x18] sm:$0xff] (!%p214_p2)  ;;  %v271_v2 = vld [vmem:[%s2040_s1] sm:$0xff] (!%p214_p2)  ;;  %v1482_v7 = vmov (!%p214_p2), 0.0   ;;  %v1483_v8 = vmov (!%p214_p2), 0.0|0.0   ;;  %s1234_s23 = sshll.u32 (!%p214_p2), %s1229_s22, 4 }
   0x6   : > { %217 = sbr.rel (%p214_p2) target bundleno = 559 (0x22f), region = 44  ;;  %v1288_v3 = vpack.c.bf16 (!%p214_p2), %v274_v1, %v272_v0  ;;  %v273_v4 = vld [vmem:[%s2040_s1 + $0x10] sm:$0xff] (!%p214_p2)  ;;  %v276_v5 = vld [vmem:[%s2040_s1 + $0x28] sm:$0xff] (!%p214_p2)  ;;  %v278_v6 = vld [vmem:[%s2040_s1 + $0x38] sm:$0xff] (!%p214_p2)  ;;  %367 = vmatprep.mubr.f32.mxu0 (!%p214_p2), %v1482_v7  ;;  %1320 = vmatprep.subr.bf16.mxu1 (!%p214_p2), %v1483_v8  ;;  %p244_p3 = scmp.lt.s32.totalorder (!%p214_p2), %s1234_s23, 31  ;;  %vm592_vm0 = vcmask (!%p214_p2), 261120  }
   0x7   : > { %v1290_v9 = vpack.c.bf16 (!%p214_p2), %v273_v4, %v271_v2  ;;  %v1292_v10 = vpack.c.bf16 (!%p214_p2), %v278_v6, %v276_v5  ;;  %v275_v11 = vld [vmem:[%s2040_s1 + $0x20] sm:$0xff] (!%p214_p2)  ;;  %v277_v12 = vld [vmem:[%s2040_s1 + $0x30] sm:$0xff] (!%p214_p2)  ;;  %v280_v13 = vld [vmem:[%s2040_s1 + $0x48] sm:$0xff] (!%p214_p2) }
   0x8   : > { %1289 = vmatprep.subr.bf16.mxu0 (!%p214_p2), %v1288_v3  ;;  %v282_v14 = vld [vmem:[%s2040_s1 + $0x58] sm:$0xff] (!%p214_p2)  ;;  %v1294_v15 = vpack.c.bf16 (!%p214_p2), %v277_v12, %v275_v11  ;;  %v279_v17 = vld [vmem:[%s2040_s1 + $0x40] sm:$0xff] (!%p214_p2)  ;;  %v281_v18 = vld [vmem:[%s2040_s1 + $0x50] sm:$0xff] (!%p214_p2) }
   0x9   : > { %1291 = vmatpush1.bf16.msra.mxu0 (!%p214_p2), %v1290_v9  ;;  %v1296_v16 = vpack.c.bf16 (!%p214_p2), %v282_v14, %v280_v13  ;;  %v284_v19 = vld [vmem:[%s2040_s1 + $0x68] sm:$0xff] (!%p214_p2)  ;;  %v286_v20 = vld [vmem:[%s2040_s1 + $0x78] sm:$0xff] (!%p214_p2)  ;;  %v1298_v21 = vpack.c.bf16 (!%p214_p2), %v281_v18, %v279_v17  ;;  %v283_v23 = vld [vmem:[%s2040_s1 + $0x60] sm:$0xff] (!%p214_p2) }
   0xa   : > { %1293 = vmatprep.subr.bf16.mxu0 (!%p214_p2), %v1292_v10  ;;  %v1300_v22 = vpack.c.bf16 (!%p214_p2), %v286_v20, %v284_v19  ;;  %v285_v24 = vld [vmem:[%s2040_s1 + $0x70] sm:$0xff] (!%p214_p2)  ;;  %v288_v25 = vld [vmem:[%s2040_s1 + $0x88] sm:$0xff] (!%p214_p2)  ;;  %v290_v26 = vld [vmem:[%s2040_s1 + $0x98] sm:$0xff] (!%p214_p2) }
   0xb   : > { %v1302_v27 = vpack.c.bf16 (!%p214_p2), %v285_v24, %v283_v23  ;;  %v1304_v28 = vpack.c.bf16 (!%p214_p2), %v290_v26, %v288_v25  ;;  %v287_v29 = vld [vmem:[%s2040_s1 + $0x80] sm:$0xff] (!%p214_p2)  ;;  %v289_v30 = vld [vmem:[%s2040_s1 + $0x90] sm:$0xff] (!%p214_p2)  ;;  %v292_v31 = vld [vmem:[%s2040_s1 + $0xa8] sm:$0xff] (!%p214_p2) }
   0xc   : > { %v294_v32 = vld [vmem:[%s2040_s1 + $0xb8] sm:$0xff] (!%p214_p2)  ;;  %v1306_v33 = vpack.c.bf16 (!%p214_p2), %v289_v30, %v287_v29  ;;  %v572_v34 = vld [vmem:[%s2042_s3] sm:$0xff] (!%p214_p2)  ;;  %v573_v35 = vld [vmem:[%s2042_s3 + $0x8] sm:$0xff] (!%p214_p2) }
   0xd   : > { %1295 = vmatpush1.bf16.msra.mxu0 %v1294_v15  ;;  %v574_v36 = vld [vmem:[%s2042_s3 + $0x10] sm:$0xff]  ;;  %v1308_v37 = vpack.c.bf16 %v294_v32, %v292_v31  ;;  %v291_v38 = vld [vmem:[%s2040_s1 + $0xa0] sm:$0xff]  ;;  %v1321_v40 = vpack.c.bf16 %v573_v35, %v572_v34  ;;  %v575_v41 = vld [vmem:[%s2042_s3 + $0x18] sm:$0xff]  ;;  %s2047_s23 = smov (!%p244_p3, %s1234_s23), 31 }
   0xe   : > { %1297 = vmatprep.subr.bf16.mxu0 %v1296_v16  ;;  %v293_v39 = vld [vmem:[%s2040_s1 + $0xb0] sm:$0xff]  ;;  %v296_v42 = vld [vmem:[%s2040_s1 + $0xc8] sm:$0xff]  ;;  %v298_v43 = vld [vmem:[%s2040_s1 + $0xd8] sm:$0xff]  ;;  %v1324_v44 = vpack.c.bf16 %v575_v41, %v574_v36  ;;  %s1235_s13 = sshll.u32 %s2047_s23, 3 }
   0xf   : > { %1322 = vmatpush1.bf16.msra.mxu1 %v1321_v40  ;;  %v1310_v45 = vpack.c.bf16 %v293_v39, %v291_v38  ;;  %v576_v46 = vld [vmem:[%s2042_s3 + $0x20] sm:$0xff]  ;;  %v577_v47 = vld [vmem:[%s2042_s3 + $0x28] sm:$0xff]  ;;  %v1312_v48 = vpack.c.bf16 %v298_v43, %v296_v42  ;;  %v297_v50 = vld [vmem:[%s2040_s1 + $0xd0] sm:$0xff]  ;;  %s1669_s20 = scalar_lea.vmem %s2039_s0, %s1235_s13  ;;  %s1975_s29 = scalar_lea.vmem %s2045_s6, %s1235_s13 }
  0x10   : > { %1323 = vmatprep.subr.bf16.mxu1 %v1483_v8  ;;  %v295_v49 = vld [vmem:[%s2040_s1 + $0xc0] sm:$0xff]  ;;  %v300_v51 = vld [vmem:[%s2040_s1 + $0xe8] sm:$0xff]  ;;  %v302_v52 = vld [vmem:[%s2040_s1 + $0xf8] sm:$0xff]  ;;  %v1327_v53 = vpack.c.bf16 %v577_v47, %v576_v46 }
  0x11   : > { %1299 = vmatpush1.bf16.msra.mxu0 %v1298_v21  ;;  %v1314_v54 = vpack.c.bf16 %v297_v50, %v295_v49  ;;  %v578_v55 = vld [vmem:[%s2042_s3 + $0x30] sm:$0xff]  ;;  %v579_v56 = vld [vmem:[%s2042_s3 + $0x38] sm:$0xff]  ;;  %v1316_v57 = vpack.c.bf16 %v302_v52, %v300_v51  ;;  %v299_v58 = vld [vmem:[%s2040_s1 + $0xe0] sm:$0xff] }
  0x12   : > { %1301 = vmatprep.subr.bf16.mxu0 %v1300_v22  ;;  %v301_v59 = vld [vmem:[%s2040_s1 + $0xf0] sm:$0xff]  ;;  %v1330_v60 = vpack.c.bf16 %v579_v56, %v578_v55  ;;  %v580_v62 = vld [vmem:[%s2042_s3 + $0x40] sm:$0xff]  ;;  %v581_v63 = vld [vmem:[%s2042_s3 + $0x48] sm:$0xff] }
  0x13   : > { %1325 = vmatpush1.bf16.msra.mxu1 %v1324_v44  ;;  %v1318_v61 = vpack.c.bf16 %v301_v59, %v299_v58  ;;  %v882_v0 = vld [vmem:[%s2041_s2] sm:$0xff]  ;;  %v883_v1 = vld [vmem:[%s2041_s2 + $0x8] sm:$0xff]  ;;  %v1333_v2 = vpack.c.bf16 %v581_v63, %v580_v62  ;;  %v582_v5 = vld [vmem:[%s2042_s3 + $0x50] sm:$0xff]  ;;  %v498_v63 = vlaneseq }
  0x14   : > { %1326 = vmatprep.subr.bf16.mxu1 %v1483_v8  ;;  %v255_v3 = vld [vmem:[%s1669_s20] sm:$0xff]  ;;  %v1678_v4 = vpack.c.bf16 %v883_v1, %v882_v0  ;;  %v583_v6 = vld [vmem:[%s2042_s3 + $0x58] sm:$0xff]  ;;  %v884_v9 = vld [vmem:[%s2041_s2 + $0x10] sm:$0xff] }
  0x15   : > { %1303 = vmatpush1.bf16.msra.mxu0 %v1302_v27  ;;  %v885_v10 = vld [vmem:[%s2041_s2 + $0x18] sm:$0xff]  ;;  %v1336_v11 = vpack.c.bf16 %v583_v6, %v582_v5  ;;  %v256_v12 = vld [vmem:[%s1669_s20 + $0x8] sm:$0xff]  ;;  %v584_v14 = vld [vmem:[%s2042_s3 + $0x60] sm:$0xff]  ;;  %v499_v0 = vshrl.u32 %v498_v63, 7 }
  0x16   : > { %1305 = vmatprep.subr.bf16.mxu0 %v1304_v28  ;;  %v1697_v13 = vpack.c.bf16 %v885_v10, %v884_v9  ;;  %v585_v15 = vld [vmem:[%s2042_s3 + $0x68] sm:$0xff]  ;;  %v886_v16 = vld [vmem:[%s2041_s2 + $0x20] sm:$0xff]  ;;  %v257_v19 = vld [vmem:[%s1669_s20 + $0x10] sm:$0xff] }
  0x17   : > { %1328 = vmatpush1.bf16.msra.mxu1 %v1327_v53  ;;  %v887_v17 = vld [vmem:[%s2041_s2 + $0x28] sm:$0xff]  ;;  %v1339_v18 = vpack.c.bf16 %v585_v15, %v584_v14  ;;  %v586_v21 = vld [vmem:[%s2042_s3 + $0x70] sm:$0xff]  ;;  %v587_v22 = vld [vmem:[%s2042_s3 + $0x78] sm:$0xff]  ;;  %v1839_v1 = vsub.s32 0, %v499_v0 }
  0x18   : > { %1329 = vmatprep.subr.bf16.mxu1 %v1483_v8  ;;  %v1716_v20 = vpack.c.bf16 %v887_v17, %v886_v16  ;;  %v888_v23 = vld [vmem:[%s2041_s2 + $0x30] sm:$0xff]  ;;  %v889_v24 = vld [vmem:[%s2041_s2 + $0x38] sm:$0xff]  ;;  %v1342_v25 = vpack.c.bf16 %v587_v22, %v586_v21  ;;  %v588_v28 = vld [vmem:[%s2042_s3 + $0x80] sm:$0xff] }
  0x19   : > { %1307 = vmatpush1.bf16.msra.mxu0 %v1306_v33  ;;  %v258_v26 = vld [vmem:[%s1669_s20 + $0x18] sm:$0xff]  ;;  %v1735_v27 = vpack.c.bf16 %v889_v24, %v888_v23  ;;  %v589_v29 = vld [vmem:[%s2042_s3 + $0x88] sm:$0xff]  ;;  %v890_v30 = vld [vmem:[%s2041_s2 + $0x40] sm:$0xff] }
  0x1a   : > { %1309 = vmatprep.subr.bf16.mxu0 %v1308_v37  ;;  %v891_v31 = vld [vmem:[%s2041_s2 + $0x48] sm:$0xff]  ;;  %v1345_v32 = vpack.c.bf16 %v589_v29, %v588_v28  ;;  %v259_v33 = vld [vmem:[%s1669_s20 + $0x20] sm:$0xff]  ;;  %v892_v35 = vld [vmem:[%s2041_s2 + $0x50] sm:$0xff] }
  0x1b   : > { %1331 = vmatpush1.bf16.msra.mxu1 %v1330_v60  ;;  %v1754_v34 = vpack.c.bf16 %v891_v31, %v890_v30  ;;  %v893_v36 = vld [vmem:[%s2041_s2 + $0x58] sm:$0xff]  ;;  %v260_v37 = vld [vmem:[%s1669_s20 + $0x28] sm:$0xff]  ;;  %v894_v39 = vld [vmem:[%s2041_s2 + $0x60] sm:$0xff] }
  0x1c   : > { %1332 = vmatprep.subr.bf16.mxu1 %v1483_v8  ;;  %v1767_v38 = vpack.c.bf16 %v893_v36, %v892_v35  ;;  %v895_v40 = vld [vmem:[%s2041_s2 + $0x68] sm:$0xff]  ;;  %v261_v41 = vld [vmem:[%s1669_s20 + $0x30] sm:$0xff]  ;;  %v897_v44 = vld [vmem:[%s2041_s2 + $0x78] sm:$0xff] }
  0x1d   : > { %1311 = vmatpush1.bf16.msra.mxu0 %v1310_v45  ;;  %v1780_v42 = vpack.c.bf16 %v895_v40, %v894_v39  ;;  %v896_v43 = vld [vmem:[%s2041_s2 + $0x70] sm:$0xff]  ;;  %v262_v45 = vld [vmem:[%s1669_s20 + $0x38] sm:$0xff]  ;;  %v263_v47 = vld [vmem:[%s1669_s20 + $0x40] sm:$0xff] }
  0x1e   : > { %1313 = vmatprep.subr.bf16.mxu0 %v1312_v48  ;;  %v1792_v46 = vpack.c.bf16 %v897_v44, %v896_v43  ;;  %v264_v48 = vld [vmem:[%s1669_s20 + $0x48] sm:$0xff]  ;;  %v265_v49 = vld [vmem:[%s1669_s20 + $0x50] sm:$0xff]  ;;  %v266_v50 = vld [vmem:[%s1669_s20 + $0x58] sm:$0xff] }
  0x1f   : > { %1334 = vmatpush1.bf16.msra.mxu1 %v1333_v2  ;;  %v267_v51 = vld [vmem:[%s1669_s20 + $0x60] sm:$0xff]  ;;  %v268_v52 = vld [vmem:[%s1669_s20 + $0x68] sm:$0xff]  ;;  %v269_v53 = vld [vmem:[%s1669_s20 + $0x70] sm:$0xff] }
  0x20   : > { %1335 = vmatprep.subr.bf16.mxu1 %v1483_v8  ;;  %v590_v55 = vld [vmem:[%s2042_s3 + $0x90] sm:$0xff]  ;;  %v591_v56 = vld [vmem:[%s2042_s3 + $0x98] sm:$0xff]  ;;  %v899_v59 = vld [vmem:[%s2041_s2 + $0x88] sm:$0xff] }
  0x21   : > { %1315 = vmatpush1.bf16.msra.mxu0 %v1314_v54  ;;  %v270_v54 = vld [vmem:[%s1669_s20 + $0x78] sm:$0xff]  ;;  %v1348_v58 = vpack.c.bf16 %v591_v56, %v590_v55  ;;  %v900_v60 = vld [vmem:[%s2041_s2 + $0x90] sm:$0xff]  ;;  %v496_v2 = vld [vmem:[%s2043_s4] sm:$0x3] }
  0x22   : > { %1317 = vmatprep.subr.bf16.mxu0 %v1316_v57  ;;  %v898_v57 = vld [vmem:[%s2041_s2 + $0x80] sm:$0xff]  ;;  %v1845_v5 = vrot.slane %v496_v2, %v1839_v1 }
  0x23   : > { %1337 = vmatpush1.bf16.msra.mxu1 %v1336_v11 }
  0x24   : > { %1338 = vmatprep.subr.bf16.mxu1 %v1483_v8 }
  0x25   : > { %1319 = vmatpush1.bf16.msra.mxu0 %v1318_v61  ;;  %v901_v61 = vld [vmem:[%s2041_s2 + $0x98] sm:$0xff] }
  0x26   : > { %1350 = vmatprep.subr.bf16.mxu0 %v1483_v8  ;;  %v1836_v62 = vpack.c.bf16 %v901_v61, %v900_v60 }
  0x27   : > { %1340 = vmatpush1.bf16.msra.mxu1 %v1339_v18 }
  0x28   : > { %368 = vmatmul.mubr.f32.vlgmr.msra.gmra.mrb[0].mxu0 %v255_v3  ;;  %1341 = vmatprep.subr.bf16.mxu1 %v1483_v8  ;;  %v504_v3 = vsub.s32 1, %v499_v0 }
  0x29   : > { %373 = vmatprep.mubr.f32.mxu0 %v1482_v7  ;;  %1352 = vmatpush1.bf16.msra.mxu0 %v1678_v4 }
  0x2a   : > { %1353 = vmatprep.subr.bf16.mxu0 %v1483_v8  ;;  %v1847_v6 = vrot.slane %v496_v2, %v504_v3 }
  0x2b   : > { %1343 = vmatpush1.bf16.msra.mxu1 %v1342_v25 }
  0x2c   : > { %374 = vmatmul.mubr.f32.gmra.mrb[2].mxu0 %v256_v12  ;;  %1344 = vmatprep.subr.bf16.mxu1 %v1483_v8 }
  0x2d   : > { %379 = vmatprep.mubr.f32.mxu0 %v1482_v7  ;;  %1355 = vmatpush1.bf16.msra.mxu0 %v1697_v13 }
  0x2e   : > { %1356 = vmatprep.subr.bf16.mxu0 %v1483_v8 }
  0x2f   : > { %1346 = vmatpush1.bf16.msra.mxu1 %v1345_v32 }
  0x30   : > { %380 = vmatmul.mubr.f32.gmra.mrb[4].mxu0 %v257_v19  ;;  %1347 = vmatprep.subr.bf16.mxu1 %v1483_v8 }
  0x31   : > { %385 = vmatprep.mubr.f32.mxu0 %v1482_v7  ;;  %1358 = vmatpush1.bf16.msra.mxu0 %v1716_v20 }
  0x32   : > { %1359 = vmatprep.subr.bf16.mxu0 %v1483_v8 }
  0x33   : > { %1349 = vmatpush1.bf16.msra.mxu1 %v1348_v58 }
  0x34   : > { %386 = vmatmul.mubr.f32.gmra.mrb[6].mxu0 %v258_v26  ;;  %1380 = vmatprep.subr.bf16.mxu1 %v1483_v8 }
  0x35   : > { %391 = vmatprep.mubr.f32.mxu0 %v1482_v7  ;;  %1361 = vmatpush1.bf16.msra.mxu0 %v1735_v27 }
  0x36   : > { %1362 = vmatprep.subr.bf16.mxu0 %v1483_v8 }
  0x38   : > { %392 = vmatmul.mubr.f32.gmra.mrb[8].mxu0 %v259_v33 }
  0x39   : > { %397 = vmatprep.mubr.f32.mxu0 %v1482_v7  ;;  %1364 = vmatpush1.bf16.msra.mxu0 %v1754_v34 }
  0x3a   : > { %1365 = vmatprep.subr.bf16.mxu0 %v1483_v8 }
  0x3c   : > { %398 = vmatmul.mubr.f32.gmra.mrb[10].mxu0 %v260_v37 }
  0x3d   : > { %403 = vmatprep.mubr.f32.mxu0 %v1482_v7  ;;  %1367 = vmatpush1.bf16.msra.mxu0 %v1767_v38 }
  0x3e   : > { %1368 = vmatprep.subr.bf16.mxu0 %v1483_v8 }
  0x40   : > { %404 = vmatmul.mubr.f32.gmra.mrb[12].mxu0 %v261_v41 }
  0x41   : > { %409 = vmatprep.mubr.f32.mxu0 %v1482_v7  ;;  %1370 = vmatpush1.bf16.msra.mxu0 %v1780_v42 }
  0x42   : > { %1371 = vmatprep.subr.bf16.mxu0 %v1483_v8 }
  0x44   : > { %410 = vmatmul.mubr.f32.gmra.mrb[14].mxu0 %v262_v45 }
  0x45   : > { %415 = vmatprep.mubr.f32.mxu0 %v1482_v7  ;;  %1373 = vmatpush1.bf16.msra.mxu0 %v1792_v46 }
  0x46   : > { %1374 = vmatprep.subr.bf16.mxu0 %v1483_v8 }
  0x48   : > { %416 = vmatmul.mubr.f32.gmra.mrb[16].mxu0 %v263_v47 }
  0x49   : > { %421 = vmatprep.mubr.f32.mxu0 %v1482_v7 }
  0x4c   : > { %422 = vmatmul.mubr.f32.gmra.mrb[18].mxu0 %v264_v48 }
  0x4d   : > { %427 = vmatprep.mubr.f32.mxu0 %v1482_v7 }
  0x50   : > { %428 = vmatmul.mubr.f32.gmra.mrb[20].mxu0 %v265_v49 }
  0x51   : > { %433 = vmatprep.mubr.f32.mxu0 %v1482_v7 }
  0x54   : > { %434 = vmatmul.mubr.f32.gmra.mrb[22].mxu0 %v266_v50 }
  0x55   : > { %439 = vmatprep.mubr.f32.mxu0 %v1482_v7 }
  0x58   : > { %440 = vmatmul.mubr.f32.gmra.mrb[24].mxu0 %v267_v51 }
  0x59   : > { %445 = vmatprep.mubr.f32.mxu0 %v1482_v7 }
  0x5c   : > { %446 = vmatmul.mubr.f32.gmra.mrb[26].mxu0 %v268_v52 }
  0x5d   : > { %451 = vmatprep.mubr.f32.mxu0 %v1482_v7 }
  0x60   : > { %452 = vmatmul.mubr.f32.gmra.mrb[28].mxu0 %v269_v53 }
  0x61   : > { %457 = vmatprep.mubr.f32.mxu0 %v1482_v7  ;;  %v1825_v7 = vpack.c.bf16 %v899_v59, %v898_v57 }
  0x63   : > { %1376 = vmatpush1.bf16.msra.mxu0 %v1825_v7 }
  0x64   : > { %458 = vmatmul.mubr.f32.gmra.mrb[30].mxu0 %v270_v54  ;;  %1377 = vmatprep.subr.bf16.mxu0 %v1483_v8 }
  0x67   : > { %1379 = vmatpush1.bf16.msra.mxu0 %v1836_v62 }
  0xfb   : > { %v369_v9 = vpop.f32.mrb[0].mxu0 }
  0xfc   : > { %vm464_vm1 = vcmp.lt.f32.partialorder %v369_v9, 0.0  ;;  %v371_v10 = vpop.f32.mrb[1].mxu0 }
  0xfd   : > { %v508_v11 = vsel %vm464_vm1, %v1845_v5, 1.0  ;;  %vm465_vm2 = vcmp.lt.f32.partialorder %v371_v10, 0.0  ;;  %1238 = vmatprep.mubr.msk.f32.mxu1 %vm592_vm0, %v371_v10 }
  0xfe   : > { %v509_v12 = vsel %vm465_vm2, %v1847_v6, 1.0  ;;  %706 = vmatmul.mubr.f32.vlgmr.msra.gmra.mrb[0].mxu1 %v369_v9  ;;  %v540_v16 = vmul.f32 %v508_v11, %v369_v9 }
  0xff   : > { %v541_v14 = vmul.f32 %v509_v12, %v371_v10  ;;  %v375_v15 = vpop.f32.mrb[2].mxu0  ;;  %1390 = vmatpush1.bf16.msra.mxu1 %v1678_v4 }
 0x100   : > { %vm466_vm3 = vcmp.lt.f32.partialorder %v375_v15, 0.0  ;;  %v377_v17 = vpop.f32.mrb[3].mxu0  ;;  %1381 = vmatprep.subr.bf16.mxu1 %v1483_v8 }
 0x101   : > { %v510_v18 = vsel %vm466_vm3, %v1845_v5, 1.0  ;;  %vm467_vm4 = vcmp.lt.f32.partialorder %v377_v17, 0.0  ;;  %1239 = vmatprep.mubr.msk.f32.mxu1 %vm592_vm0, %v377_v17  ;;  %1270 = vmatprep.mubr.msk.f32.mxu0 %vm592_vm0, %v541_v14 }
 0x102   : > { %v511_v19 = vsel %vm467_vm4, %v1847_v6, 1.0  ;;  %711 = vmatmul.mubr.f32.gmra.mrb[2].mxu1 %v375_v15  ;;  %1015 = vmatmul.mubr.f32.vlgmr.msra.gmra.mrb[32].mxu0 %v540_v16  ;;  %v542_v4 = vmul.f32 %v510_v18, %v375_v15 }
 0x103   : > { %v543_v21 = vmul.f32 %v511_v19, %v377_v17  ;;  %v381_v22 = vpop.f32.mrb[4].mxu0  ;;  %1391 = vmatpush1.bf16.msra.mxu1 %v1697_v13 }
 0x104   : > { %vm468_vm5 = vcmp.lt.f32.partialorder %v381_v22, 0.0  ;;  %v383_v23 = vpop.f32.mrb[5].mxu0  ;;  %1382 = vmatprep.subr.bf16.mxu1 %v1483_v8 }
 0x105   : > { %v512_v24 = vsel %vm468_vm5, %v1845_v5, 1.0  ;;  %vm469_vm6 = vcmp.lt.f32.partialorder %v383_v23, 0.0  ;;  %1240 = vmatprep.mubr.msk.f32.mxu1 %vm592_vm0, %v383_v23  ;;  %1271 = vmatprep.mubr.msk.f32.mxu0 %vm592_vm0, %v543_v21 }
 0x106   : > { %v513_v25 = vsel %vm469_vm6, %v1847_v6, 1.0  ;;  %716 = vmatmul.mubr.f32.gmra.mrb[4].mxu1 %v381_v22  ;;  %1020 = vmatmul.mubr.f32.gmra.mrb[34].mxu0 %v542_v4  ;;  %v544_v13 = vmul.f32 %v512_v24, %v381_v22 }
 0x107   : > { %v545_v26 = vmul.f32 %v513_v25, %v383_v23  ;;  %v387_v28 = vpop.f32.mrb[6].mxu0  ;;  %1392 = vmatpush1.bf16.msra.mxu1 %v1716_v20 }
 0x108   : > { %vm470_vm7 = vcmp.lt.f32.partialorder %v387_v28, 0.0  ;;  %v389_v29 = vpop.f32.mrb[7].mxu0  ;;  %1383 = vmatprep.subr.bf16.mxu1 %v1483_v8 }
 0x109   : > { %v514_v30 = vsel %vm470_vm7, %v1845_v5, 1.0  ;;  %vm471_vm8 = vcmp.lt.f32.partialorder %v389_v29, 0.0  ;;  %1241 = vmatprep.mubr.msk.f32.mxu1 %vm592_vm0, %v389_v29  ;;  %1272 = vmatprep.mubr.msk.f32.mxu0 %vm592_vm0, %v545_v26 }
 0x10a   : > { %v515_v31 = vsel %vm471_vm8, %v1847_v6, 1.0  ;;  %721 = vmatmul.mubr.f32.gmra.mrb[6].mxu1 %v387_v28  ;;  %1025 = vmatmul.mubr.f32.gmra.mrb[36].mxu0 %v544_v13  ;;  %v546_v20 = vmul.f32 %v514_v30, %v387_v28 }
 0x10b   : > { %v547_v32 = vmul.f32 %v515_v31, %v389_v29  ;;  %v393_v33 = vpop.f32.mrb[8].mxu0  ;;  %1393 = vmatpush1.bf16.msra.mxu1 %v1735_v27 }
 0x10c   : > { %vm472_vm9 = vcmp.lt.f32.partialorder %v393_v33, 0.0  ;;  %v395_v35 = vpop.f32.mrb[9].mxu0  ;;  %1384 = vmatprep.subr.bf16.mxu1 %v1483_v8 }
 0x10d   : > { %v516_v36 = vsel %vm472_vm9, %v1845_v5, 1.0  ;;  %vm473_vm10 = vcmp.lt.f32.partialorder %v395_v35, 0.0  ;;  %1242 = vmatprep.mubr.msk.f32.mxu1 %vm592_vm0, %v395_v35  ;;  %1273 = vmatprep.mubr.msk.f32.mxu0 %vm592_vm0, %v547_v32 }
 0x10e   : > { %v517_v37 = vsel %vm473_vm10, %v1847_v6, 1.0  ;;  %726 = vmatmul.mubr.f32.gmra.mrb[8].mxu1 %v393_v33  ;;  %1030 = vmatmul.mubr.f32.gmra.mrb[38].mxu0 %v546_v20  ;;  %v548_v27 = vmul.f32 %v516_v36, %v393_v33 }
 0x10f   : > { %v549_v39 = vmul.f32 %v517_v37, %v395_v35  ;;  %v399_v40 = vpop.f32.mrb[10].mxu0  ;;  %1394 = vmatpush1.bf16.msra.mxu1 %v1754_v34 }
 0x110   : > { %vm474_vm11 = vcmp.lt.f32.partialorder %v399_v40, 0.0  ;;  %v401_v41 = vpop.f32.mrb[11].mxu0  ;;  %1385 = vmatprep.subr.bf16.mxu1 %v1483_v8 }
 0x111   : > { %v518_v43 = vsel %vm474_vm11, %v1845_v5, 1.0  ;;  %vm475_vm12 = vcmp.lt.f32.partialorder %v401_v41, 0.0  ;;  %1243 = vmatprep.mubr.msk.f32.mxu1 %vm592_vm0, %v401_v41  ;;  %1274 = vmatprep.mubr.msk.f32.mxu0 %vm592_vm0, %v549_v39 }
 0x112   : > { %v519_v44 = vsel %vm475_vm12, %v1847_v6, 1.0  ;;  %731 = vmatmul.mubr.f32.gmra.mrb[10].mxu1 %v399_v40  ;;  %1035 = vmatmul.mubr.f32.gmra.mrb[40].mxu0 %v548_v27  ;;  %v550_v34 = vmul.f32 %v518_v43, %v399_v40 }
 0x113   : > { %v551_v45 = vmul.f32 %v519_v44, %v401_v41  ;;  %v405_v47 = vpop.f32.mrb[12].mxu0  ;;  %1395 = vmatpush1.bf16.msra.mxu1 %v1767_v38 }
 0x114   : > { %vm476_vm13 = vcmp.lt.f32.partialorder %v405_v47, 0.0  ;;  %v407_v48 = vpop.f32.mrb[13].mxu0  ;;  %1386 = vmatprep.subr.bf16.mxu1 %v1483_v8 }
 0x115   : > { %v520_v49 = vsel %vm476_vm13, %v1845_v5, 1.0  ;;  %vm477_vm14 = vcmp.lt.f32.partialorder %v407_v48, 0.0  ;;  %1244 = vmatprep.mubr.msk.f32.mxu1 %vm592_vm0, %v407_v48  ;;  %1275 = vmatprep.mubr.msk.f32.mxu0 %vm592_vm0, %v551_v45 }
 0x116   : > { %v521_v50 = vsel %vm477_vm14, %v1847_v6, 1.0  ;;  %736 = vmatmul.mubr.f32.gmra.mrb[12].mxu1 %v405_v47  ;;  %1040 = vmatmul.mubr.f32.gmra.mrb[42].mxu0 %v550_v34  ;;  %v552_v38 = vmul.f32 %v520_v49, %v405_v47 }
 0x117   : > { %v553_v51 = vmul.f32 %v521_v50, %v407_v48  ;;  %v411_v52 = vpop.f32.mrb[14].mxu0  ;;  %1396 = vmatpush1.bf16.msra.mxu1 %v1780_v42 }
 0x118   : > { %vm478_vm15 = vcmp.lt.f32.partialorder %v411_v52, 0.0  ;;  %v413_v53 = vpop.f32.mrb[15].mxu0  ;;  %1387 = vmatprep.subr.bf16.mxu1 %v1483_v8 }
 0x119   : > { %v522_v54 = vsel %vm478_vm15, %v1845_v5, 1.0  ;;  %vm479_vm1 = vcmp.lt.f32.partialorder %v413_v53, 0.0  ;;  %1245 = vmatprep.mubr.msk.f32.mxu1 %vm592_vm0, %v413_v53  ;;  %1276 = vmatprep.mubr.msk.f32.mxu0 %vm592_vm0, %v553_v51 }
 0x11a   : > { %v523_v55 = vsel %vm479_vm1, %v1847_v6, 1.0  ;;  %741 = vmatmul.mubr.f32.gmra.mrb[14].mxu1 %v411_v52  ;;  %1045 = vmatmul.mubr.f32.gmra.mrb[44].mxu0 %v552_v38  ;;  %v554_v42 = vmul.f32 %v522_v54, %v411_v52 }
 0x11b   : > { %v555_v56 = vmul.f32 %v523_v55, %v413_v53  ;;  %v417_v57 = vpop.f32.mrb[16].mxu0  ;;  %1397 = vmatpush1.bf16.msra.mxu1 %v1792_v46 }
 0x11c   : > { %vm480_vm2 = vcmp.lt.f32.partialorder %v417_v57, 0.0  ;;  %v419_v58 = vpop.f32.mrb[17].mxu0  ;;  %1388 = vmatprep.subr.bf16.mxu1 %v1483_v8 }
 0x11d   : > { %v524_v59 = vsel %vm480_vm2, %v1845_v5, 1.0  ;;  %vm481_vm3 = vcmp.lt.f32.partialorder %v419_v58, 0.0  ;;  %1246 = vmatprep.mubr.msk.f32.mxu1 %vm592_vm0, %v419_v58  ;;  %1277 = vmatprep.mubr.msk.f32.mxu0 %vm592_vm0, %v555_v56 }
 0x11e   : > { %v525_v60 = vsel %vm481_vm3, %v1847_v6, 1.0  ;;  %746 = vmatmul.mubr.f32.gmra.mrb[16].mxu1 %v417_v57  ;;  %1050 = vmatmul.mubr.f32.gmra.mrb[46].mxu0 %v554_v42  ;;  %v556_v46 = vmul.f32 %v524_v59, %v417_v57 }
 0x11f   : > { %v557_v61 = vmul.f32 %v525_v60, %v419_v58  ;;  %v1900_v63 = vpop.f32.mrb[18].mxu0  ;;  %1398 = vmatpush1.bf16.msra.mxu1 %v1825_v7 }
 0x120   : > { %v425_v0 = vpop.f32.mrb[19].mxu0  ;;  %1389 = vmatprep.subr.bf16.mxu1 %v1483_v8  ;;  %vm482_vm14 = vcmp.lt.f32.partialorder %v1900_v63, 0.0 }
 0x121   : > { %1247 = vmatprep.mubr.msk.f32.mxu1 %vm592_vm0, %v425_v0  ;;  %1278 = vmatprep.mubr.msk.f32.mxu0 %vm592_vm0, %v557_v61  ;;  %vm483_vm11 = vcmp.lt.f32.partialorder %v425_v0, 0.0  ;;  %v526_v36 = vsel %vm482_vm14, %v1845_v5, 1.0 }
 0x122   : > { %751 = vmatmul.mubr.f32.gmra.mrb[18].mxu1 %v1900_v63  ;;  %1055 = vmatmul.mubr.f32.gmra.mrb[48].mxu0 %v556_v46  ;;  %v527_v30 = vsel %vm483_vm11, %v1847_v6, 1.0  ;;  %v558_v44 = vmul.f32 %v526_v36, %v1900_v63  ;;  %v1095_v63 = vld [vmem:[%s2044_s5] sm:$0x1] }
 0x123   : > { %v429_v2 = vpop.f32.mrb[20].mxu0  ;;  %1399 = vmatpush1.bf16.msra.mxu1 %v1836_v62  ;;  %v559_v37 = vmul.f32 %v527_v30, %v425_v0 }
 0x124   : > { %vm484_vm4 = vcmp.lt.f32.partialorder %v429_v2, 0.0  ;;  %v1908_v3 = vpop.f32.mrb[21].mxu0 }
 0x125   : > { %v528_v9 = vsel %vm484_vm4, %v1845_v5, 1.0  ;;  %1248 = vmatprep.mubr.msk.f32.mxu1 %vm592_vm0, %v1908_v3  ;;  %vm485_vm15 = vcmp.lt.f32.partialorder %v1908_v3, 0.0 }
 0x126   : > { %v1913_v7 = vmul.f32 %v528_v9, %v429_v2  ;;  %756 = vmatmul.mubr.f32.gmra.mrb[20].mxu1 %v429_v2  ;;  %v529_v40 = vsel %vm485_vm15, %v1847_v6, 1.0 }
 0x127   : > { %v435_v8 = vpop.f32.mrb[22].mxu0  ;;  %v561_v45 = vmul.f32 %v529_v40, %v1908_v3 }
 0x128   : > { %vm486_vm5 = vcmp.lt.f32.partialorder %v435_v8, 0.0  ;;  %v437_v10 = vpop.f32.mrb[23].mxu0 }
 0x129   : > { %v530_v11 = vsel %vm486_vm5, %v1845_v5, 1.0  ;;  %vm487_vm6 = vcmp.lt.f32.partialorder %v437_v10, 0.0  ;;  %1249 = vmatprep.mubr.msk.f32.mxu1 %vm592_vm0, %v437_v10 }
 0x12a   : > { %v562_v62 = vmul.f32 %v530_v11, %v435_v8  ;;  %v531_v12 = vsel %vm487_vm6, %v1847_v6, 1.0  ;;  %761 = vmatmul.mubr.f32.gmra.mrb[22].mxu1 %v435_v8 }
 0x12b   : > { %v563_v14 = vmul.f32 %v531_v12, %v437_v10  ;;  %v441_v15 = vpop.f32.mrb[24].mxu0  ;;  %v1096_v10 = vsub.f32 1.0, %v1095_v63 }
 0x12c   : > { %vm488_vm7 = vcmp.lt.f32.partialorder %v441_v15, 0.0  ;;  %v443_v16 = vpop.f32.mrb[25].mxu0 }
 0x12d   : > { %v532_v17 = vsel %vm488_vm7, %v1845_v5, 1.0  ;;  %vm489_vm8 = vcmp.lt.f32.partialorder %v443_v16, 0.0  ;;  %1250 = vmatprep.mubr.msk.f32.mxu1 %vm592_vm0, %v443_v16 }
 0x12e   : > { %v564_v18 = vmul.f32 %v532_v17, %v441_v15  ;;  %v533_v19 = vsel %vm489_vm8, %v1847_v6, 1.0  ;;  %766 = vmatmul.mubr.f32.gmra.mrb[24].mxu1 %v441_v15 }
 0x12f   : > { %v565_v21 = vmul.f32 %v533_v19, %v443_v16  ;;  %v447_v22 = vpop.f32.mrb[26].mxu0 }
 0x130   : > { %vm490_vm9 = vcmp.lt.f32.partialorder %v447_v22, 0.0  ;;  %v449_v4 = vpop.f32.mrb[27].mxu0 }
 0x131   : > { %v534_v23 = vsel %vm490_vm9, %v1845_v5, 1.0  ;;  %vm491_vm10 = vcmp.lt.f32.partialorder %v449_v4, 0.0  ;;  %1251 = vmatprep.mubr.msk.f32.mxu1 %vm592_vm0, %v449_v4 }
 0x132   : > { %v566_v24 = vmul.f32 %v534_v23, %v447_v22  ;;  %v535_v25 = vsel %vm491_vm10, %v1847_v6, 1.0  ;;  %771 = vmatmul.mubr.f32.gmra.mrb[26].mxu1 %v447_v22 }
 0x133   : > { %v567_v26 = vmul.f32 %v535_v25, %v449_v4  ;;  %v453_v28 = vpop.f32.mrb[28].mxu0  ;;  %v1964_v4 = vrot.slane %v1095_v63, %v1839_v1 }
 0x134   : > { %vm492_vm12 = vcmp.lt.f32.partialorder %v453_v28, 0.0  ;;  %v455_v13 = vpop.f32.mrb[29].mxu0 }
 0x135   : > { %v536_v29 = vsel %vm492_vm12, %v1845_v5, 1.0  ;;  %vm493_vm13 = vcmp.lt.f32.partialorder %v455_v13, 0.0  ;;  %1252 = vmatprep.mubr.msk.f32.mxu1 %vm592_vm0, %v455_v13 }
 0x136   : > { %v568_v31 = vmul.f32 %v536_v29, %v453_v28  ;;  %v537_v32 = vsel %vm493_vm13, %v1847_v6, 1.0  ;;  %776 = vmatmul.mubr.f32.gmra.mrb[28].mxu1 %v453_v28 }
 0x137   : > { %v569_v33 = vmul.f32 %v537_v32, %v455_v13  ;;  %v459_v20 = vpop.f32.mrb[30].mxu0 }
 0x138   : > { %vm494_vm1 = vcmp.lt.f32.partialorder %v459_v20, 0.0  ;;  %v461_v35 = vpop.f32.mrb[31].mxu0 }
 0x139   : > { %v538_v39 = vsel %vm494_vm1, %v1845_v5, 1.0  ;;  %vm495_vm2 = vcmp.lt.f32.partialorder %v461_v35, 0.0  ;;  %1253 = vmatprep.mubr.msk.f32.mxu1 %vm592_vm0, %v461_v35 }
 0x13a   : > { %v570_v27 = vmul.f32 %v538_v39, %v459_v20  ;;  %v539_v41 = vsel %vm495_vm2, %v1847_v6, 1.0  ;;  %781 = vmatmul.mubr.f32.gmra.mrb[30].mxu1 %v459_v20 }
 0x13b   : > { %v571_v43 = vmul.f32 %v539_v41, %v461_v35  ;;  %1279 = vmatprep.mubr.msk.f32.mxu1 %vm592_vm0, %v559_v37 }
 0x13e   : > { %1060 = vmatmul.mubr.f32.vlgmr.msra.gmra.mrb[32].mxu1 %v558_v44 }
 0x13f   : > { %1280 = vmatprep.mubr.msk.f32.mxu1 %vm592_vm0, %v561_v45 }
 0x142   : > { %1065 = vmatmul.mubr.f32.gmra.mrb[34].mxu1 %v1913_v7 }
 0x143   : > { %1281 = vmatprep.mubr.msk.f32.mxu1 %vm592_vm0, %v563_v14 }
 0x146   : > { %1070 = vmatmul.mubr.f32.gmra.mrb[36].mxu1 %v562_v62 }
 0x147   : > { %1282 = vmatprep.mubr.msk.f32.mxu1 %vm592_vm0, %v565_v21 }
 0x14a   : > { %1075 = vmatmul.mubr.f32.gmra.mrb[38].mxu1 %v564_v18  ;;  %v1959_v18 = vrot.slane %v1096_v10, %v1839_v1 }
 0x14b   : > { %1283 = vmatprep.mubr.msk.f32.mxu1 %vm592_vm0, %v567_v26 }
 0x14e   : > { %1080 = vmatmul.mubr.f32.gmra.mrb[40].mxu1 %v566_v24 }
 0x14f   : > { %1284 = vmatprep.mubr.msk.f32.mxu1 %vm592_vm0, %v569_v33 }
 0x152   : > { %1085 = vmatmul.mubr.f32.gmra.mrb[42].mxu1 %v568_v31 }
 0x153   : > { %1285 = vmatprep.mubr.msk.f32.mxu1 %vm592_vm0, %v571_v43 }
 0x156   : > { %1090 = vmatmul.mubr.f32.gmra.mrb[44].mxu1 %v570_v27 }
 0x1d1   : > { %v707_v5 = vpop.f32.mrb[0].mxu1 }
 0x1d2   : > { %v1254_v6 = vmul.f32 -1.442695, %v707_v5  ;;  %v709_v47 = vpop.f32.mrb[1].mxu1 }
 0x1d4   : > { %1410 = vpow2.f32 %v1254_v6 }
 0x1d5   : > { %v712_v34 = vpop.f32.mrb[2].mxu1  ;;  %v1945_v48 = vpop.f32.mrb[32].mxu0 }
 0x1d6   : > { %v1255_v49 = vmul.f32 -1.442695, %v712_v34  ;;  %v714_v50 = vpop.f32.mrb[3].mxu1  ;;  %v1018_v51 = vpop.f32.mrb[33].mxu0 }
 0x1d8   : > { %1412 = vpow2.f32 %v1255_v49 }
 0x1d9   : > { %v717_v52 = vpop.f32.mrb[4].mxu1  ;;  %v1947_v38 = vpop.f32.mrb[34].mxu0 }
 0x1da   : > { %v1256_v53 = vmul.f32 -1.442695, %v717_v52  ;;  %v719_v54 = vpop.f32.mrb[5].mxu1  ;;  %v1023_v55 = vpop.f32.mrb[35].mxu0 }
 0x1dc   : > { %1414 = vpow2.f32 %v1256_v53 }
 0x1dd   : > { %v722_v56 = vpop.f32.mrb[6].mxu1  ;;  %v1949_v57 = vpop.f32.mrb[36].mxu0 }
 0x1de   : > { %v1411_v42 = vpop.eup %1410  ;;  %v1257_v58 = vmul.f32 -1.442695, %v722_v56  ;;  %v724_v59 = vpop.f32.mrb[7].mxu1 }
 0x1df   : > { %v1028_v60 = vpop.f32.mrb[37].mxu0  ;;  %v834_v61 = vadd.f32 1.0, %v1411_v42 }
 0x1e0   : > { %1416 = vpow2.f32 %v1257_v58 }
 0x1e1   : > { %1418 = vrcp.f32 %v834_v61  ;;  %v727_v46 = vpop.f32.mrb[8].mxu1  ;;  %v1954_v0 = vpop.f32.mrb[38].mxu0 }
 0x1e2   : > { %v1413_v2 = vpop.eup %1412  ;;  %v1258_v3 = vmul.f32 -1.442695, %v727_v46  ;;  %v729_v9 = vpop.f32.mrb[9].mxu1 }
 0x1e3   : > { %v1033_v7 = vpop.f32.mrb[39].mxu0  ;;  %v835_v8 = vadd.f32 1.0, %v1413_v2 }
 0x1e4   : > { %1420 = vpow2.f32 %v1258_v3 }
 0x1e5   : > { %1422 = vrcp.f32 %v835_v8  ;;  %v732_v11 = vpop.f32.mrb[10].mxu1  ;;  %v1956_v62 = vpop.f32.mrb[40].mxu0 }
 0x1e6   : > { %v1415_v12 = vpop.eup %1414  ;;  %v1259_v14 = vmul.f32 -1.442695, %v732_v11  ;;  %v734_v15 = vpop.f32.mrb[11].mxu1 }
 0x1e7   : > { %v1038_v16 = vpop.f32.mrb[41].mxu0  ;;  %v836_v17 = vadd.f32 1.0, %v1415_v12 }
 0x1e8   : > { %1424 = vpow2.f32 %v1259_v14 }
 0x1e9   : > { %1426 = vrcp.f32 %v836_v17  ;;  %v737_v19 = vpop.f32.mrb[12].mxu1  ;;  %v1961_v21 = vpop.f32.mrb[42].mxu0 }
 0x1ea   : > { %v1417_v22 = vpop.eup %1416  ;;  %v1260_v23 = vmul.f32 -1.442695, %v737_v19  ;;  %v739_v24 = vpop.f32.mrb[13].mxu1 }
 0x1eb   : > { %v1043_v25 = vpop.f32.mrb[43].mxu0  ;;  %v1419_v26 = vpop.eup %1418  ;;  %v837_v28 = vadd.f32 1.0, %v1417_v22 }
 0x1ec   : > { %v1103_v13 = vmul.f32 %v1419_v26, %v1959_v18  ;;  %1428 = vpow2.f32 %v1260_v23 }
 0x1ed   : > { %1430 = vrcp.f32 %v837_v28  ;;  %v742_v29 = vpop.f32.mrb[14].mxu1  ;;  %v1967_v30 = vpop.f32.mrb[44].mxu0 }
 0x1ee   : > { %v1421_v31 = vpop.eup %1420  ;;  %v1125_v32 = vadd.f32 %v1964_v4, %v1103_v13  ;;  %v1261_v33 = vmul.f32 -1.442695, %v742_v29  ;;  %v744_v20 = vpop.f32.mrb[15].mxu1 }
 0x1ef   : > { %v1048_v1 = vpop.f32.mrb[45].mxu0  ;;  %v1423_v35 = vpop.eup %1422  ;;  %v838_v36 = vadd.f32 1.0, %v1421_v31 }
 0x1f0   : > { %v1141_v37 = vmul.f32 %v1125_v32, %v1945_v48  ;;  %v1104_v39 = vmul.f32 %v1423_v35, %v1959_v18  ;;  %1432 = vpow2.f32 %v1261_v33 }
 0x1f1   : > { %1434 = vrcp.f32 %v838_v36  ;;  %v747_v40 = vpop.f32.mrb[16].mxu1  ;;  %v1979_v27 = vpop.f32.mrb[46].mxu0 }
 0x1f2   : > { %v1425_v41 = vpop.eup %1424  ;;  %1157 = vst [vmem:[%s1975_s29] sm:$0xff] %v1141_v37  ;;  %v1126_v43 = vadd.f32 %v1964_v4, %v1104_v39  ;;  %v1262_v44 = vmul.f32 -1.442695, %v747_v40  ;;  %v749_v45 = vpop.f32.mrb[17].mxu1 }
 0x1f3   : > { %v1053_v5 = vpop.f32.mrb[47].mxu0  ;;  %v1427_v6 = vpop.eup %1426  ;;  %v839_v47 = vadd.f32 1.0, %v1425_v41 }
 0x1f4   : > { %v1142_v34 = vmul.f32 %v1126_v43, %v1947_v38  ;;  %v1105_v48 = vmul.f32 %v1427_v6, %v1959_v18  ;;  %1436 = vpow2.f32 %v1262_v44 }
 0x1f5   : > { %1438 = vrcp.f32 %v839_v47  ;;  %v752_v49 = vpop.f32.mrb[18].mxu1  ;;  %v1985_v50 = vpop.f32.mrb[48].mxu0 }
 0x1f6   : > { %v1429_v51 = vpop.eup %1428  ;;  %1158 = vst [vmem:[%s1975_s29 + $0x8] sm:$0xff] %v1142_v34  ;;  %v1127_v52 = vadd.f32 %v1964_v4, %v1105_v48  ;;  %v1263_v53 = vmul.f32 -1.442695, %v752_v49  ;;  %v754_v54 = vpop.f32.mrb[19].mxu1 }
 0x1f7   : > { %v1058_v55 = vpop.f32.mrb[49].mxu0  ;;  %v1431_v56 = vpop.eup %1430  ;;  %v840_v42 = vadd.f32 1.0, %v1429_v51 }
 0x1f8   : > { %v1143_v58 = vmul.f32 %v1127_v52, %v1949_v57  ;;  %v1106_v38 = vmul.f32 %v1431_v56, %v1959_v18  ;;  %1440 = vpow2.f32 %v1263_v53 }
 0x1f9   : > { %1442 = vrcp.f32 %v840_v42  ;;  %v757_v59 = vpop.f32.mrb[20].mxu1 }
 0x1fa   : > { %v1433_v60 = vpop.eup %1432  ;;  %1159 = vst [vmem:[%s1975_s29 + $0x10] sm:$0xff] %v1143_v58  ;;  %v1128_v61 = vadd.f32 %v1964_v4, %v1106_v38  ;;  %v1264_v63 = vmul.f32 -1.442695, %v757_v59  ;;  %v759_v46 = vpop.f32.mrb[21].mxu1 }
 0x1fb   : > { %v1435_v2 = vpop.eup %1434  ;;  %v841_v3 = vadd.f32 1.0, %v1433_v60 }
 0x1fc   : > { %v1144_v9 = vmul.f32 %v1128_v61, %v1954_v0  ;;  %v1107_v7 = vmul.f32 %v1435_v2, %v1959_v18  ;;  %1444 = vpow2.f32 %v1264_v63 }
 0x1fd   : > { %1446 = vrcp.f32 %v841_v3  ;;  %v762_v57 = vpop.f32.mrb[22].mxu1 }
 0x1fe   : > { %v1437_v8 = vpop.eup %1436  ;;  %1160 = vst [vmem:[%s1975_s29 + $0x18] sm:$0xff] %v1144_v9  ;;  %v1129_v10 = vadd.f32 %v1964_v4, %v1107_v7  ;;  %v1265_v11 = vmul.f32 -1.442695, %v762_v57  ;;  %v764_v12 = vpop.f32.mrb[23].mxu1 }
 0x1ff   : > { %v1439_v14 = vpop.eup %1438  ;;  %v842_v15 = vadd.f32 1.0, %v1437_v8 }
 0x200   : > { %v1145_v16 = vmul.f32 %v1129_v10, %v1956_v62  ;;  %v1108_v17 = vmul.f32 %v1439_v14, %v1959_v18  ;;  %1448 = vpow2.f32 %v1265_v11 }
 0x201   : > { %1450 = vrcp.f32 %v842_v15  ;;  %v767_v0 = vpop.f32.mrb[24].mxu1 }
 0x202   : > { %v1441_v19 = vpop.eup %1440  ;;  %1161 = vst [vmem:[%s1975_s29 + $0x20] sm:$0xff] %v1145_v16  ;;  %v1130_v22 = vadd.f32 %v1964_v4, %v1108_v17  ;;  %v1266_v23 = vmul.f32 -1.442695, %v767_v0  ;;  %v769_v24 = vpop.f32.mrb[25].mxu1 }
 0x203   : > { %v1443_v25 = vpop.eup %1442  ;;  %v843_v26 = vadd.f32 1.0, %v1441_v19 }
 0x204   : > { %v1146_v28 = vmul.f32 %v1130_v22, %v1961_v21  ;;  %v1109_v13 = vmul.f32 %v1443_v25, %v1959_v18  ;;  %1452 = vpow2.f32 %v1266_v23 }
 0x205   : > { %1454 = vrcp.f32 %v843_v26  ;;  %v772_v62 = vpop.f32.mrb[26].mxu1 }
 0x206   : > { %v1445_v29 = vpop.eup %1444  ;;  %1162 = vst [vmem:[%s1975_s29 + $0x28] sm:$0xff] %v1146_v28  ;;  %v1131_v31 = vadd.f32 %v1964_v4, %v1109_v13  ;;  %v1267_v32 = vmul.f32 -1.442695, %v772_v62  ;;  %v774_v33 = vpop.f32.mrb[27].mxu1 }
 0x207   : > { %v1447_v20 = vpop.eup %1446  ;;  %v844_v1 = vadd.f32 1.0, %v1445_v29 }
 0x208   : > { %v1147_v35 = vmul.f32 %v1131_v31, %v1967_v30  ;;  %v1110_v36 = vmul.f32 %v1447_v20, %v1959_v18  ;;  %1456 = vpow2.f32 %v1267_v32 }
 0x209   : > { %1458 = vrcp.f32 %v844_v1  ;;  %v777_v21 = vpop.f32.mrb[28].mxu1 }
 0x20a   : > { %v1449_v37 = vpop.eup %1448  ;;  %1163 = vst [vmem:[%s1975_s29 + $0x30] sm:$0xff] %v1147_v35  ;;  %v1132_v39 = vadd.f32 %v1964_v4, %v1110_v36  ;;  %v1268_v40 = vmul.f32 -1.442695, %v777_v21  ;;  %v779_v41 = vpop.f32.mrb[29].mxu1 }
 0x20b   : > { %v1451_v43 = vpop.eup %1450  ;;  %v845_v44 = vadd.f32 1.0, %v1449_v37 }
 0x20c   : > { %v1148_v45 = vmul.f32 %v1132_v39, %v1979_v27  ;;  %v1111_v5 = vmul.f32 %v1451_v43, %v1959_v18  ;;  %1460 = vpow2.f32 %v1268_v40 }
 0x20d   : > { %1462 = vrcp.f32 %v845_v44  ;;  %v782_v30 = vpop.f32.mrb[30].mxu1 }
 0x20e   : > { %v1453_v6 = vpop.eup %1452  ;;  %1164 = vst [vmem:[%s1975_s29 + $0x38] sm:$0xff] %v1148_v45  ;;  %v1133_v47 = vadd.f32 %v1964_v4, %v1111_v5  ;;  %v1269_v34 = vmul.f32 -1.442695, %v782_v30  ;;  %v784_v48 = vpop.f32.mrb[31].mxu1 }
 0x20f   : > { %v1455_v49 = vpop.eup %1454  ;;  %v846_v51 = vadd.f32 1.0, %v1453_v6 }
 0x210   : > { %v1149_v52 = vmul.f32 %v1133_v47, %v1985_v50  ;;  %1464 = vpow2.f32 %v1269_v34  ;;  %v1112_v27 = vmul.f32 %v1455_v49, %v1959_v18 }
 0x211   : > { %1466 = vrcp.f32 %v846_v51  ;;  %v1061_v53 = vpop.f32.mrb[32].mxu1 }
 0x212   : > { %v1457_v54 = vpop.eup %1456  ;;  %1165 = vst [vmem:[%s1975_s29 + $0x40] sm:$0xff] %v1149_v52  ;;  %v1134_v55 = vadd.f32 %v1964_v4, %v1112_v27  ;;  %v1063_v56 = vpop.f32.mrb[33].mxu1 }
 0x213   : > { %v1459_v42 = vpop.eup %1458  ;;  %v847_v58 = vadd.f32 1.0, %v1457_v54 }
 0x214   : > { %v1150_v38 = vmul.f32 %v1134_v55, %v1061_v53  ;;  %v1113_v59 = vmul.f32 %v1459_v42, %v1959_v18 }
 0x215   : > { %1468 = vrcp.f32 %v847_v58  ;;  %v1066_v60 = vpop.f32.mrb[34].mxu1 }
 0x216   : > { %v1461_v50 = vpop.eup %1460  ;;  %1166 = vst [vmem:[%s1975_s29 + $0x48] sm:$0xff] %v1150_v38  ;;  %v1135_v61 = vadd.f32 %v1964_v4, %v1113_v59  ;;  %v1068_v63 = vpop.f32.mrb[35].mxu1 }
 0x217   : > { %v1463_v46 = vpop.eup %1462  ;;  %v848_v2 = vadd.f32 1.0, %v1461_v50 }
 0x218   : > { %v1151_v3 = vmul.f32 %v1135_v61, %v1066_v60  ;;  %v1114_v9 = vmul.f32 %v1463_v46, %v1959_v18 }
 0x219   : > { %1470 = vrcp.f32 %v848_v2  ;;  %v1071_v7 = vpop.f32.mrb[36].mxu1 }
 0x21a   : > { %v1465_v57 = vpop.eup %1464  ;;  %1167 = vst [vmem:[%s1975_s29 + $0x50] sm:$0xff] %v1151_v3  ;;  %v1136_v8 = vadd.f32 %v1964_v4, %v1114_v9  ;;  %v1073_v10 = vpop.f32.mrb[37].mxu1 }
 0x21b   : > { %v1467_v11 = vpop.eup %1466  ;;  %v849_v12 = vadd.f32 1.0, %v1465_v57 }
 0x21c   : > { %v1152_v14 = vmul.f32 %v1136_v8, %v1071_v7  ;;  %v1115_v15 = vmul.f32 %v1467_v11, %v1959_v18 }
 0x21d   : > { %1472 = vrcp.f32 %v849_v12  ;;  %v1076_v16 = vpop.f32.mrb[38].mxu1 }
 0x21e   : > { %1168 = vst [vmem:[%s1975_s29 + $0x58] sm:$0xff] %v1152_v14  ;;  %v1137_v17 = vadd.f32 %v1964_v4, %v1115_v15  ;;  %v1078_v0 = vpop.f32.mrb[39].mxu1 }
 0x21f   : > { %v1469_v19 = vpop.eup %1468 }
 0x220   : > { %v1153_v22 = vmul.f32 %v1137_v17, %v1076_v16  ;;  %v1116_v23 = vmul.f32 %v1469_v19, %v1959_v18 }
 0x221   : > { %v1081_v24 = vpop.f32.mrb[40].mxu1 }
 0x222   : > { %1169 = vst [vmem:[%s1975_s29 + $0x60] sm:$0xff] %v1153_v22  ;;  %v1138_v25 = vadd.f32 %v1964_v4, %v1116_v23  ;;  %v1083_v26 = vpop.f32.mrb[41].mxu1 }
 0x223   : > { %v1471_v28 = vpop.eup %1470 }
 0x224   : > { %v1154_v13 = vmul.f32 %v1138_v25, %v1081_v24  ;;  %v1117_v62 = vmul.f32 %v1471_v28, %v1959_v18 }
 0x225   : > { %v1086_v29 = vpop.f32.mrb[42].mxu1 }
 0x226   : > { %1170 = vst [vmem:[%s1975_s29 + $0x68] sm:$0xff] %v1154_v13  ;;  %v1139_v31 = vadd.f32 %v1964_v4, %v1117_v62  ;;  %v1088_v32 = vpop.f32.mrb[43].mxu1 }
 0x227   : > { %v1473_v33 = vpop.eup %1472 }
 0x228   : > { %v1155_v20 = vmul.f32 %v1139_v31, %v1086_v29  ;;  %v1118_v1 = vmul.f32 %v1473_v33, %v1959_v18 }
 0x229   : > { %v1091_v35 = vpop.f32.mrb[44].mxu1 }
 0x22a   : > { %1171 = vst [vmem:[%s1975_s29 + $0x70] sm:$0xff] %v1155_v20  ;;  %v1140_v36 = vadd.f32 %v1964_v4, %v1118_v1  ;;  %v1093_v21 = vpop.f32.mrb[45].mxu1 }
 0x22c   : > { %v1156_v37 = vmul.f32 %v1140_v36, %v1091_v35 }
 0x22e   : > { %1172 = vst [vmem:[%s1975_s29 + $0x78] sm:$0xff] %v1156_v37 }
 0x22f PF: > { %s16_s21 = sadd.s32 1, %s1480_s21  }
 0x230   : > { %p13_p4 = scmp.ge.s32.totalorder %s16_s21, 4  }
 0x232   :  { %15 = sbr.rel (!%p13_p4) target bundleno = 1 (0x1), region = 74 }

</bundles_post_ra>
